<compile_context>
chip_gen: v5e
topology: v5e:2x2
jax: 0.10.0
libtpu: 0.0.40
codegen_flags: <defaults>
</compile_context>

<pallas_src>
import jax
import jax.numpy as jnp
from jax.experimental import pallas as pl
from jax.experimental.pallas import tpu as pltpu


def _relation_linear_kernel(s_ref, q_ref, w1s_ref, w1q_ref, b1_ref, w2_ref,
                            b2_ref, o_ref):
    # s_ref, q_ref: (tm, D) native dtype;  w1s/w1q: (D, R) native dtype
    # b1: (1, R) f32;  w2: (R, 1) f32;  b2: (1, 1) f32 scalar in SMEM
    # o_ref: (1, tm//128, 128)
    # First linear (split-W1 == linear on concat(s, q)); MXU accumulates in f32.
    h = jnp.dot(s_ref[...], w1s_ref[...], preferred_element_type=jnp.float32)
    h = h + jnp.dot(q_ref[...], w1q_ref[...], preferred_element_type=jnp.float32)
    h = jnp.maximum(h + b1_ref[...], 0.0)                       # (tm, R), ReLU

    # Second linear on the (otherwise idle) MXU, then one layout shuffle to a
    # lane-dense tile; bias + sigmoid run on the dense vregs.
    logit = jnp.dot(h, w2_ref[...], preferred_element_type=jnp.float32)  # (tm,1)
    logit = logit.reshape(o_ref.shape)                          # (1, tm//128, 128)
    o_ref[...] = jax.nn.sigmoid(logit + b2_ref[0, 0]).astype(o_ref.dtype)


def _round_up(x, m):
    return ((x + m - 1) // m) * m


def _vmem_budgets():
    """(working budget for our tiles, vmem_limit_bytes) — generation aware."""
    cap = 64 * 1024 * 1024  # conservative fallback (v7x per-TC VMEM)
    try:
        info = pltpu.get_tpu_info()
        cap = int(getattr(info, "vmem_capacity_bytes", cap))
    except Exception:
        pass
    return (cap * 3) // 5, (cap * 3) // 4


def _choose_tm(M, D, R, in_itemsize, out_itemsize, budget_bytes):
    """Biggest multiple-of-128 row tile whose VMEM footprint (double-buffered
    inputs + resident weights + f32 hidden + lane-dense output) fits budget."""
    d_eff = _round_up(max(D, 1), 128)
    r_eff = _round_up(max(R, 1), 128)
    # Resident weight/bias tiles (assume pipeline double-buffers them), f32
    # worst case: two W1 halves + b1 + w2 column.
    fixed = 2 * (2 * d_eff * r_eff + 2 * r_eff) * 4
    avail = max(budget_bytes - fixed, 2 * 1024 * 1024)
    # Per row: s,q double-buffered at native width + f32 hidden (with slack)
    # + double-buffered lane-dense output.
    per_row = 2 * 2 * d_eff * in_itemsize + 2 * r_eff * 4 + 2 * out_itemsize
    tm = (int(avail // per_row) // 128) * 128
    # Don't allocate more rows per step than the problem needs; keep >=2 grid
    # steps when M is large enough so both v7x TensorCores get work.
    if M > 256:
        target = _round_up(-(-M // 2), 128)
    else:
        target = _round_up(M, 128)
    return max(128, min(tm, 8192, target))


def relation_linear(support, query, w1, b1, w2, b2):
    """support, query: [B, totalQ, N, D]; w1: [R, 2D]; b1: [R]; w2: [1, R];
    b2: [1]  ->  relation_score: [B, totalQ, N]"""
    B, Q, N, D = support.shape
    assert query.shape == support.shape
    R = w1.shape[0]
    assert w1.shape == (R, 2 * D) and b1.shape == (R,)
    assert w2.shape == (1, R) and b2.shape == (1,)

    M = B * Q * N
    s2 = support.reshape(M, D)
    q2 = query.reshape(M, D)

    budget, vmem_limit = _vmem_budgets()
    tm = _choose_tm(M, D, R, s2.dtype.itemsize, support.dtype.itemsize, budget)
    num_blocks = pl.cdiv(M, tm)
    rows_per_blk = tm // 128

    # Split W1 column-wise: s @ W1s^T + q @ W1q^T == concat(s, q) @ W1^T.
    # Streamed/matmul operands keep their native dtype; tiny second-layer
    # operands are pre-cast to f32 once in the wrapper.
    w1s_t = jnp.transpose(w1[:, :D])                    # (D, R)
    w1q_t = jnp.transpose(w1[:, D:])                    # (D, R)
    b1_2d = b1.reshape(1, R).astype(jnp.float32)        # (1, R)
    w2_col = jnp.transpose(w2).astype(jnp.float32)      # (R, 1)
    b2_2d = b2.reshape(1, 1).astype(jnp.float32)        # (1, 1) scalar (SMEM)

    out = pl.pallas_call(
        _relation_linear_kernel,
        out_shape=jax.ShapeDtypeStruct((num_blocks, rows_per_blk, 128),
                                       support.dtype),
        grid_spec=pltpu.PrefetchScalarGridSpec(
            num_scalar_prefetch=0,
            grid=(num_blocks,),
            in_specs=[
                pl.BlockSpec((tm, D), lambda i: (i, 0)),    # support rows
                pl.BlockSpec((tm, D), lambda i: (i, 0)),    # query rows
                pl.BlockSpec((D, R), lambda i: (0, 0)),     # W1 support-half^T
                pl.BlockSpec((D, R), lambda i: (0, 0)),     # W1 query-half^T
                pl.BlockSpec((1, R), lambda i: (0, 0)),     # b1
                pl.BlockSpec((R, 1), lambda i: (0, 0)),     # w2 column
                pl.BlockSpec(memory_space=pltpu.MemorySpace.SMEM),  # b2 scalar
            ],
            out_specs=pl.BlockSpec((1, rows_per_blk, 128),
                                   lambda i: (i, 0, 0)),    # lane-dense output
        ),
        compiler_params=pltpu.CompilerParams(
            dimension_semantics=("parallel",),
            vmem_limit_bytes=vmem_limit,
        ),
    )(s2, q2, w1s_t, w1q_t, b1_2d, w2_col, b2_2d)

    # Rows >= M (edge-block garbage) are sliced away here.
    return out.reshape(-1)[:M].reshape(B, Q, N)


def _reference(support, query, w1, b1, w2, b2):
    x = jnp.concatenate([support, query], axis=-1)
    h = jax.nn.relu(jnp.einsum("...d,rd->...r", x, w1) + b1)
    y = jax.nn.sigmoid(jnp.einsum("...r,or->...o", h, w2) + b2)
    return y[..., 0]


if __name__ == "__main__":
    key = jax.random.PRNGKey(0)
    k1, k2, k3, k4, k5, k6 = jax.random.split(key, 6)

    B, totalQ, N, D, R = 2, 8, 4, 32, 64   # hidden_size=32, relation_size=64
    support = jax.random.normal(k1, (B, totalQ, N, D), dtype=jnp.float32)
    query = jax.random.normal(k2, (B, totalQ, N, D), dtype=jnp.float32)

    # Weight init (forward-pass semantics only; kaiming/xavier-style scales).
    fan_in1 = 2 * D
    bound1 = (6.0 / fan_in1) ** 0.5
    w1 = jax.random.uniform(k3, (R, 2 * D), minval=-bound1, maxval=bound1,
                            dtype=jnp.float32)
    b1 = jax.random.uniform(k4, (R,), minval=-1.0 / fan_in1 ** 0.5,
                            maxval=1.0 / fan_in1 ** 0.5, dtype=jnp.float32)
    bound2 = (6.0 / (R + 1)) ** 0.5
    w2 = jax.random.uniform(k5, (1, R), minval=-bound2, maxval=bound2,
                            dtype=jnp.float32)
    b2 = jax.random.uniform(k6, (1,), minval=-1.0 / R ** 0.5,
                            maxval=1.0 / R ** 0.5, dtype=jnp.float32)

    out = relation_linear(support, query, w1, b1, w2, b2)
    out = jax.block_until_ready(out)

    ref = _reference(support, query, w1, b1, w2, b2)
    assert out.shape == (B, totalQ, N)
    assert jnp.allclose(out, ref, atol=1e-5, rtol=1e-5)

    print("KERNEL_OK")
</pallas_src>

<mosaic_0001>
module attributes {stable_mosaic.version = 11 : i64} {
  func.func @_relation_linear_kernel(%arg0: i32, %arg1: memref<128x32xf32, #tpu.memory_space<vmem>>, %arg2: memref<128x32xf32, #tpu.memory_space<vmem>>, %arg3: memref<32x64xf32, #tpu.memory_space<vmem>>, %arg4: memref<32x64xf32, #tpu.memory_space<vmem>>, %arg5: memref<1x64xf32, #tpu.memory_space<vmem>>, %arg6: memref<64x1xf32, #tpu.memory_space<vmem>>, %arg7: memref<1x1xf32, #tpu.memory_space<smem>>, %arg8: memref<1x1x128xf32, #tpu.memory_space<vmem>>) attributes {dimension_semantics = [#tpu.dimension_semantics<parallel>], iteration_bounds = array<i64: 1>, scalar_prefetch = 0 : i64, scratch_operands = 0 : i64, tpu.core_type = #tpu.core_type<tc>, window_params = [{transform_indices = @transform_0, window_bounds = array<i64: 128, 32>}, {transform_indices = @transform_1, window_bounds = array<i64: 128, 32>}, {pipeline_mode = #tpu.pipeline_mode<synchronous>, transform_indices = @transform_2, window_bounds = array<i64: 32, 64>}, {pipeline_mode = #tpu.pipeline_mode<synchronous>, transform_indices = @transform_3, window_bounds = array<i64: 32, 64>}, {pipeline_mode = #tpu.pipeline_mode<synchronous>, transform_indices = @transform_4, window_bounds = array<i64: 1, 64>}, {pipeline_mode = #tpu.pipeline_mode<synchronous>, transform_indices = @transform_5, window_bounds = array<i64: 64, 1>}, {transform_indices = @transform_6, window_bounds = array<i64: 1, 1>}, {transform_indices = @transform_7, window_bounds = array<i64: 1, 1, 128>}]} {
    %c0 = arith.constant 0 : index
    %c0_0 = arith.constant 0 : index
    %0 = vector.load %arg1[%c0, %c0_0] : memref<128x32xf32, #tpu.memory_space<vmem>>, vector<128x32xf32>
    %c0_1 = arith.constant 0 : index
    %c0_2 = arith.constant 0 : index
    %1 = vector.load %arg3[%c0_1, %c0_2] : memref<32x64xf32, #tpu.memory_space<vmem>>, vector<32x64xf32>
    %cst = arith.constant dense<0.000000e+00> : vector<128x64xf32>
    %2 = tpu.matmul %0, %1, %cst {dimension_numbers = #tpu.dot_dimension_numbers<[1], [0], [0], [1], [0, 0, 1, 1], [], []>} : vector<128x32xf32>, vector<32x64xf32>, vector<128x64xf32> -> vector<128x64xf32>
    %c0_3 = arith.constant 0 : index
    %c0_4 = arith.constant 0 : index
    %3 = vector.load %arg2[%c0_3, %c0_4] : memref<128x32xf32, #tpu.memory_space<vmem>>, vector<128x32xf32>
    %c0_5 = arith.constant 0 : index
    %c0_6 = arith.constant 0 : index
    %4 = vector.load %arg4[%c0_5, %c0_6] : memref<32x64xf32, #tpu.memory_space<vmem>>, vector<32x64xf32>
    %cst_7 = arith.constant dense<0.000000e+00> : vector<128x64xf32>
    %5 = tpu.matmul %3, %4, %cst_7 {dimension_numbers = #tpu.dot_dimension_numbers<[1], [0], [0], [1], [0, 0, 1, 1], [], []>} : vector<128x32xf32>, vector<32x64xf32>, vector<128x64xf32> -> vector<128x64xf32>
    %6 = arith.addf %2, %5 : vector<128x64xf32>
    %c0_8 = arith.constant 0 : index
    %c0_9 = arith.constant 0 : index
    %7 = vector.load %arg5[%c0_8, %c0_9] : memref<1x64xf32, #tpu.memory_space<vmem>>, vector<1x64xf32>
    %8 = vector.broadcast %7 : vector<1x64xf32> to vector<128x64xf32>
    %9 = arith.addf %6, %8 : vector<128x64xf32>
    %cst_10 = arith.constant 0.000000e+00 : f32
    %10 = vector.broadcast %cst_10 : f32 to vector<128x64xf32>
    %11 = arith.maximumf %9, %10 : vector<128x64xf32>
    %c0_11 = arith.constant 0 : index
    %c0_12 = arith.constant 0 : index
    %12 = vector.load %arg6[%c0_11, %c0_12] : memref<64x1xf32, #tpu.memory_space<vmem>>, vector<64x1xf32>
    %cst_13 = arith.constant dense<0.000000e+00> : vector<128x1xf32>
    %13 = tpu.matmul %11, %12, %cst_13 {dimension_numbers = #tpu.dot_dimension_numbers<[1], [0], [0], [1], [0, 0, 1, 1], [], []>} : vector<128x64xf32>, vector<64x1xf32>, vector<128x1xf32> -> vector<128x1xf32>
    %14 = vector.shape_cast %13 : vector<128x1xf32> to vector<1x1x128xf32>
    %c0_14 = arith.constant 0 : index
    %c0_15 = arith.constant 0 : index
    %15 = memref.load %arg7[%c0_14, %c0_15] : memref<1x1xf32, #tpu.memory_space<smem>>
    %16 = vector.broadcast %15 : f32 to vector<1x1x128xf32>
    %17 = arith.addf %14, %16 : vector<1x1x128xf32>
    %18 = arith.negf %17 : vector<1x1x128xf32>
    %19 = math.exp %18 : vector<1x1x128xf32>
    %cst_16 = arith.constant 1.000000e+00 : f32
    %20 = vector.broadcast %cst_16 : f32 to vector<1x1x128xf32>
    %21 = arith.addf %20, %19 : vector<1x1x128xf32>
    %22 = arith.divf %20, %21 : vector<1x1x128xf32>
    %c0_17 = arith.constant 0 : index
    %c0_18 = arith.constant 0 : index
    %c0_19 = arith.constant 0 : index
    %23 = vector.load %arg8[%c0_17, %c0_18, %c0_19] : memref<1x1x128xf32, #tpu.memory_space<vmem>>, vector<1x1x128xf32>
    tpu.vector_store %arg8[%c0_17, %c0_18, %c0_19], %22 {strides = array<i32>} : memref<1x1x128xf32, #tpu.memory_space<vmem>>, vector<1x1x128xf32>,
    return
  }
  func.func @transform_0(%arg0: i32) -> (i32, i32) {
    %c0_i32 = arith.constant 0 : i32
    %c0_i32_0 = arith.constant 0 : i32
    return %arg0, %c0_i32 : i32, i32
  }
  func.func @transform_1(%arg0: i32) -> (i32, i32) {
    %c0_i32 = arith.constant 0 : i32
    %c0_i32_0 = arith.constant 0 : i32
    return %arg0, %c0_i32 : i32, i32
  }
  func.func @transform_2(%arg0: i32) -> (i32, i32) {
    %c0_i32 = arith.constant 0 : i32
    %c0_i32_0 = arith.constant 0 : i32
    %c0_i32_1 = arith.constant 0 : i32
    return %c0_i32, %c0_i32_0 : i32, i32
  }
  func.func @transform_3(%arg0: i32) -> (i32, i32) {
    %c0_i32 = arith.constant 0 : i32
    %c0_i32_0 = arith.constant 0 : i32
    %c0_i32_1 = arith.constant 0 : i32
    return %c0_i32, %c0_i32_0 : i32, i32
  }
  func.func @transform_4(%arg0: i32) -> (i32, i32) {
    %c0_i32 = arith.constant 0 : i32
    %c0_i32_0 = arith.constant 0 : i32
    %c0_i32_1 = arith.constant 0 : i32
    return %c0_i32, %c0_i32_0 : i32, i32
  }
  func.func @transform_5(%arg0: i32) -> (i32, i32) {
    %c0_i32 = arith.constant 0 : i32
    %c0_i32_0 = arith.constant 0 : i32
    %c0_i32_1 = arith.constant 0 : i32
    return %c0_i32, %c0_i32_0 : i32, i32
  }
  func.func @transform_6(%arg0: i32) -> (i32, i32) {
    %c0_i32 = arith.constant 0 : i32
    %c0_i32_0 = arith.constant 0 : i32
    %c0_i32_1 = arith.constant 0 : i32
    return %c0_i32, %c0_i32_0 : i32, i32
  }
  func.func @transform_7(%arg0: i32) -> (i32, i32, i32) {
    %c0_i32 = arith.constant 0 : i32
    %c0_i32_0 = arith.constant 0 : i32
    %c0_i32_1 = arith.constant 0 : i32
    return %arg0, %c0_i32, %c0_i32_0 : i32, i32, i32
  }
}

</mosaic_0001>

<bundles_post_ra>
// kernel: tpu_custom_call.1
= control target key start
LH: loop header
LB: loop body
LE: loop exit
PB: predicated region body
PF: predicated region fallthrough
CT: control target
= control target key end

     0   :  { %vm68_vm0 = vcmask 261120   ;;  %s1393_s0 = inlined_call_operand.vmem [shape: f32[64,32], index: 0, kind: input, shape index: {}]   ;;  %s1394_s1 = inlined_call_operand.vmem [shape: f32[64,32], index: 1, kind: input, shape index: {}]   ;;  %s1395_s2 = inlined_call_operand.vmem [shape: f32[32,64], index: 2, kind: input, shape index: {}]   ;;  %s1396_s3 = inlined_call_operand.vmem [shape: f32[32,64], index: 3, kind: input, shape index: {}]   ;;  %s1397_s4 = inlined_call_operand.vmem [shape: f32[1,64], index: 4, kind: input, shape index: {}]   ;;  %s1398_s5 = inlined_call_operand.vmem [shape: f32[64,1], index: 5, kind: input, shape index: {}]   ;;  %s1399_s6 = inlined_call_operand.<no memory space> [shape: f32[1,1], index: 6, kind: input, shape index: {}]   ;;  %s1400_s7 = inlined_call_operand.hbm [shape: f32[1,1,128], index: 7, kind: output, shape index: {}]  }
   0x1   :  { %v67_v0 = vld [vmem:[%s1396_s3 + $0x18] sm:$0xff]  ;;  %v66_v2 = vld [vmem:[%s1396_s3 + $0x10] sm:$0xff]  ;;  %v65_v4 = vld [vmem:[%s1396_s3 + $0x8] sm:$0xff] }
   0x2   :  { %v47_v1 = vld [vmem:[%s1395_s2 + $0x18] sm:$0xff]  ;;  %129 = vmatpush.msra.mxu0 %v67_v0  ;;  %v46_v3 = vld [vmem:[%s1395_s2 + $0x10] sm:$0xff]  ;;  %v45_v5 = vld [vmem:[%s1395_s2 + $0x8] sm:$0xff]  ;;  %984 = vmatpush.msra.mxu3 %v67_v0 }
   0x3   :  { %242 = vmatpush.msra.mxu1 %v47_v1  ;;  %v64_v6 = vld [vmem:[%s1396_s3] sm:$0xff] }
   0x4   :  { %130 = vmatpush.msra.mxu0 %v66_v2  ;;  %v44_v7 = vld [vmem:[%s1395_s2] sm:$0xff]  ;;  %985 = vmatpush.msra.mxu3 %v66_v2 }
   0x5   :  { %243 = vmatpush.msra.mxu1 %v46_v3  ;;  %v48_v8 = vld [vmem:[%s1394_s1] sm:$0xff] }
   0x6   :  { %131 = vmatpush.msra.mxu0 %v65_v4  ;;  %v28_v9 = vld [vmem:[%s1393_s0] sm:$0xff]  ;;  %986 = vmatpush.msra.mxu3 %v65_v4 }
   0x7   :  { %244 = vmatpush.msra.mxu1 %v45_v5 }
   0x8   :  { %13 = vsyncpa [#allocation4], 0  ;;  %132 = vmatpush.msra.mxu0 %v64_v6  ;;  %987 = vmatpush.msra.mxu3 %v64_v6  ;;  %v49_v10 = vld [vmem:[%s1394_s1 + $0x8] sm:$0xff]  ;;  %v50_v12 = vld [vmem:[%s1394_s1 + $0x10] sm:$0xff]  ;;  %vm339_vm1 = vcmask 523264   ;;  %s911_s23 = sshll.u32 %s1400_s7, 4  ;;  %s912_s23 = int_to_ptr.hbm [resolvable:$true] %s911_s23 }
   0x9   :  { %245 = vmatpush.msra.mxu1 %v44_v7  ;;  %920 = vmatmul.msk.f32.vlgmr.msra.gmra.mxu0 %vm68_vm0, %v48_v8  ;;  %v29_v11 = vld [vmem:[%s1393_s0 + $0x8] sm:$0xff]  ;;  %v30_v13 = vld [vmem:[%s1393_s0 + $0x10] sm:$0xff]  ;;  %v51_v15 = vld [vmem:[%s1394_s1 + $0x18] sm:$0xff] }
   0xa   :  { %936 = vmatmul.msk.f32.vlgmr.msra.gmra.mxu1 %vm68_vm0, %v28_v9  ;;  %988 = vmatpush.msrb.mxu3 %v47_v1  ;;  %v61_v14 = vld [vmem:[%s1394_s1 + $0x68] sm:$0xff]  ;;  %v31_v16 = vld [vmem:[%s1393_s0 + $0x18] sm:$0xff]  ;;  %v62_v17 = vld [vmem:[%s1394_s1 + $0x70] sm:$0xff] }
   0xb   :  { %933 = vmatmul.msk.f32.vlgmr.msra.gmra.mxu3 %vm68_vm0, %v61_v14  ;;  %v52_v18 = vld [vmem:[%s1394_s1 + $0x20] sm:$0xff]  ;;  %v63_v20 = vld [vmem:[%s1394_s1 + $0x78] sm:$0xff]  ;;  %v53_v21 = vld [vmem:[%s1394_s1 + $0x28] sm:$0xff] }
   0xc   :  { %989 = vmatpush.msrb.mxu3 %v46_v3  ;;  %v32_v19 = vld [vmem:[%s1393_s0 + $0x20] sm:$0xff]  ;;  %v33_v22 = vld [vmem:[%s1393_s0 + $0x28] sm:$0xff]  ;;  %v54_v24 = vld [vmem:[%s1394_s1 + $0x30] sm:$0xff] }
   0xd   :  { %v41_v23 = vld [vmem:[%s1393_s0 + $0x68] sm:$0xff]  ;;  %v34_v25 = vld [vmem:[%s1393_s0 + $0x30] sm:$0xff]  ;;  %v55_v27 = vld [vmem:[%s1394_s1 + $0x38] sm:$0xff] }
   0xe   :  { %990 = vmatpush.msrb.mxu3 %v45_v5  ;;  %v42_v26 = vld [vmem:[%s1393_s0 + $0x70] sm:$0xff]  ;;  %v35_v28 = vld [vmem:[%s1393_s0 + $0x38] sm:$0xff]  ;;  %v56_v30 = vld [vmem:[%s1394_s1 + $0x40] sm:$0xff] }
   0xf   :  { %v43_v29 = vld [vmem:[%s1393_s0 + $0x78] sm:$0xff]  ;;  %v36_v31 = vld [vmem:[%s1393_s0 + $0x40] sm:$0xff]  ;;  %v337_v33 = vld [vmem:[%s1398_s5 + $0x30] sm:$0xff] }
  0x10   :  { %991 = vmatpush.msrb.mxu3 %v44_v7  ;;  %v338_v32 = vld [vmem:[%s1398_s5 + $0x38] sm:$0xff]  ;;  %v336_v34 = vld [vmem:[%s1398_s5 + $0x28] sm:$0xff]  ;;  %v335_v35 = vld [vmem:[%s1398_s5 + $0x20] sm:$0xff] }
  0x11   :  { %921 = vmatmul.msk.f32.gmra.mxu0 %vm68_vm0, %v49_v10  ;;  %396 = vmatpush.msra.mxu2 %v338_v32  ;;  %v57_v36 = vld [vmem:[%s1394_s1 + $0x48] sm:$0xff]  ;;  %v58_v38 = vld [vmem:[%s1394_s1 + $0x50] sm:$0xff]  ;;  %v59_v40 = vld [vmem:[%s1394_s1 + $0x58] sm:$0xff] }
  0x12   :  { %937 = vmatmul.msk.f32.gmra.mxu1 %vm68_vm0, %v29_v11  ;;  %992 = vmatpush.msra.mxu3 %v338_v32  ;;  %v37_v37 = vld [vmem:[%s1393_s0 + $0x48] sm:$0xff]  ;;  %v38_v39 = vld [vmem:[%s1393_s0 + $0x50] sm:$0xff]  ;;  %v39_v41 = vld [vmem:[%s1393_s0 + $0x58] sm:$0xff] }
  0x13   :  { %934 = vmatmul.msk.f32.gmra.mxu3 %vm68_vm0, %v62_v17  ;;  %397 = vmatpush.msra.mxu2 %v337_v33  ;;  %v334_v42 = vld [vmem:[%s1398_s5 + $0x18] sm:$0xff]  ;;  %v60_v43 = vld [vmem:[%s1394_s1 + $0x60] sm:$0xff]  ;;  %v333_v45 = vld [vmem:[%s1398_s5 + $0x10] sm:$0xff] }
  0x14   :  { %993 = vmatpush.msra.mxu3 %v337_v33  ;;  %v40_v44 = vld [vmem:[%s1393_s0 + $0x60] sm:$0xff]  ;;  %v332_v46 = vld [vmem:[%s1398_s5 + $0x8] sm:$0xff] }
  0x15   :  { %398 = vmatpush.msra.mxu2 %v336_v34  ;;  %v331_v47 = vld [vmem:[%s1398_s5] sm:$0xff] }
  0x16   :  { %994 = vmatpush.msra.mxu3 %v336_v34  ;;  %v1317_v48 = vld [vmem:[%s1397_s4] ss:$0 sm:$0xff] }
  0x17   :  { %399 = vmatpush.msra.mxu2 %v335_v35 }
  0x18   :  { %995 = vmatpush.msra.mxu3 %v335_v35 }
  0x19   :  { %922 = vmatmul.msk.f32.gmra.mxu0 %vm68_vm0, %v50_v12  ;;  %400 = vmatpush.msra.mxu2 %v334_v42 }
  0x1a   :  { %938 = vmatmul.msk.f32.gmra.mxu1 %vm68_vm0, %v30_v13  ;;  %996 = vmatpush.msra.mxu3 %v334_v42 }
  0x1b   :  { %935 = vmatmul.msk.f32.gmra.mxu3 %vm68_vm0, %v63_v20  ;;  %401 = vmatpush.msra.mxu2 %v333_v45 }
  0x1c   :  { %997 = vmatpush.msra.mxu3 %v333_v45 }
  0x1d   :  { %402 = vmatpush.msra.mxu2 %v332_v46 }
  0x1e   :  { %998 = vmatpush.msra.mxu3 %v332_v46 }
  0x1f   :  { %403 = vmatpush.msra.mxu2 %v331_v47 }
  0x20   :  { %999 = vmatpush.msra.mxu3 %v331_v47 }
  0x21   :  { %923 = vmatmul.msk.f32.gmra.mxu0 %vm68_vm0, %v51_v15 }
  0x22   :  { %939 = vmatmul.msk.f32.gmra.mxu1 %vm68_vm0, %v31_v16 }
  0x23   :  { %949 = vmatmul.msk.f32.vlgmr.msrb.gmra.mxu3 %vm68_vm0, %v41_v23 }
  0x29   :  { %924 = vmatmul.msk.f32.gmra.mxu0 %vm68_vm0, %v52_v18 }
  0x2a   :  { %940 = vmatmul.msk.f32.gmra.mxu1 %vm68_vm0, %v32_v19 }
  0x2b   :  { %950 = vmatmul.msk.f32.gmra.mxu3 %vm68_vm0, %v42_v26 }
  0x31   :  { %925 = vmatmul.msk.f32.gmra.mxu0 %vm68_vm0, %v53_v21 }
  0x32   :  { %941 = vmatmul.msk.f32.gmra.mxu1 %vm68_vm0, %v33_v22 }
  0x33   :  { %951 = vmatmul.msk.f32.gmra.mxu3 %vm68_vm0, %v43_v29 }
  0x39   :  { %926 = vmatmul.msk.f32.gmra.mxu0 %vm68_vm0, %v54_v24 }
  0x3a   :  { %942 = vmatmul.msk.f32.gmra.mxu1 %vm68_vm0, %v34_v25 }
  0x41   :  { %927 = vmatmul.msk.f32.gmra.mxu0 %vm68_vm0, %v55_v27 }
  0x42   :  { %943 = vmatmul.msk.f32.gmra.mxu1 %vm68_vm0, %v35_v28 }
  0x49   :  { %928 = vmatmul.msk.f32.gmra.mxu0 %vm68_vm0, %v56_v30 }
  0x4a   :  { %944 = vmatmul.msk.f32.gmra.mxu1 %vm68_vm0, %v36_v31 }
  0x51   :  { %929 = vmatmul.msk.f32.gmra.mxu0 %vm68_vm0, %v57_v36 }
  0x52   :  { %945 = vmatmul.msk.f32.gmra.mxu1 %vm68_vm0, %v37_v37 }
  0x59   :  { %930 = vmatmul.msk.f32.gmra.mxu0 %vm68_vm0, %v58_v38 }
  0x5a   :  { %946 = vmatmul.msk.f32.gmra.mxu1 %vm68_vm0, %v38_v39 }
  0x61   :  { %931 = vmatmul.msk.f32.gmra.mxu0 %vm68_vm0, %v59_v40 }
  0x62   :  { %947 = vmatmul.msk.f32.gmra.mxu1 %vm68_vm0, %v39_v41 }
  0x69   :  { %932 = vmatmul.msk.f32.gmra.mxu0 %vm68_vm0, %v60_v43 }
  0x6a   :  { %948 = vmatmul.msk.f32.gmra.mxu1 %vm68_vm0, %v40_v44 }
  0x86   :  { %v134_v49 = vpop.f32.mrf.mxu0 }
  0x87   :  { %v247_v50 = vpop.f32.mrf.mxu1 }
  0x88   :  { %v248_v51 = vadd.f32 %v247_v50, %v134_v49 }
  0x8a   :  { %v299_v52 = vadd.f32 %v1317_v48, %v248_v51 }
  0x8c   :  { %v315_v53 = vmax.f32 %v299_v52, 0.0 }
  0x8e   :  { %952 = vmatmul.msk.f32.vlgmr.msra.gmra.mxu2 %vm339_vm1, %v315_v53  ;;  %v137_v54 = vpop.f32.mrf.mxu0  ;;  %v173_v25 = vpop.f32.mrf.mxu3 }
  0x8f   :  { %v250_v55 = vpop.f32.mrf.mxu1 }
  0x90   :  { %v251_v56 = vadd.f32 %v250_v55, %v137_v54 }
  0x92   :  { %v300_v57 = vadd.f32 %v1317_v48, %v251_v56 }
  0x94   :  { %v316_v58 = vmax.f32 %v300_v57, 0.0 }
  0x96   :  { %953 = vmatmul.msk.f32.gmra.mxu2 %vm339_vm1, %v316_v58  ;;  %v140_v59 = vpop.f32.mrf.mxu0  ;;  %v176_v34 = vpop.f32.mrf.mxu3 }
  0x97   :  { %v253_v60 = vpop.f32.mrf.mxu1 }
  0x98   :  { %v254_v61 = vadd.f32 %v253_v60, %v140_v59 }
  0x9a   :  { %v301_v62 = vadd.f32 %v1317_v48, %v254_v61 }
  0x9c   :  { %v317_v63 = vmax.f32 %v301_v62, 0.0 }
  0x9e   :  { %954 = vmatmul.msk.f32.gmra.mxu2 %vm339_vm1, %v317_v63  ;;  %v143_v0 = vpop.f32.mrf.mxu0  ;;  %v179_v41 = vpop.f32.mrf.mxu3 }
  0x9f   :  { %v256_v1 = vpop.f32.mrf.mxu1 }
  0xa0   :  { %v257_v2 = vadd.f32 %v256_v1, %v143_v0 }
  0xa2   :  { %v302_v3 = vadd.f32 %v1317_v48, %v257_v2  ;;  %v1354_v2 = vstv %s1399_s6  ;;  %s1097_s6 = smov [#allocation3]  }
  0xa3   :  { %s909_s3 = sshll.u32 %s1097_s6, 4  ;;  %s910_s3 = int_to_ptr.vmem [resolvable:$true] %s909_s3 }
  0xa4   :  { %v318_v4 = vmax.f32 %v302_v3, 0.0  ;;  %v1096_v3 = vmov 0  }
  0xa5   :  { %1002 = vset.pattern.permute.xlu0 %v1096_v3  ;;  %1003 = vset.pattern.permute.xlu1 %v1096_v3 }
  0xa6   :  { %955 = vmatmul.msk.f32.gmra.mxu2 %vm339_vm1, %v318_v4  ;;  %v146_v5 = vpop.f32.mrf.mxu0  ;;  %v286_v49 = vpop.f32.mrf.mxu3  ;;  %1004 = vset.pattern.permute.xlu2 %v1096_v3 }
  0xa7   :  { %v259_v6 = vpop.f32.mrf.mxu1  ;;  %v287_v54 = vadd.f32 %v286_v49, %v173_v25 }
  0xa8   :  { %v260_v7 = vadd.f32 %v259_v6, %v146_v5 }
  0xa9   :  { %v312_v57 = vadd.f32 %v1317_v48, %v287_v54 }
  0xaa   :  { %v303_v8 = vadd.f32 %v1317_v48, %v260_v7 }
  0xab   :  { %v328_v58 = vmax.f32 %v312_v57, 0.0 }
  0xac   :  { %v319_v9 = vmax.f32 %v303_v8, 0.0 }
  0xae   :  { %956 = vmatmul.msk.f32.gmra.mxu2 %vm339_vm1, %v319_v9  ;;  %v149_v10 = vpop.f32.mrf.mxu0  ;;  %v289_v56 = vpop.f32.mrf.mxu3 }
  0xaf   :  { %v262_v11 = vpop.f32.mrf.mxu1  ;;  %v290_v59 = vadd.f32 %v289_v56, %v176_v34 }
  0xb0   :  { %v263_v12 = vadd.f32 %v262_v11, %v149_v10 }
  0xb1   :  { %v313_v60 = vadd.f32 %v1317_v48, %v290_v59 }
  0xb2   :  { %v304_v13 = vadd.f32 %v1317_v48, %v263_v12 }
  0xb3   :  { %v329_v62 = vmax.f32 %v313_v60, 0.0 }
  0xb4   :  { %v320_v14 = vmax.f32 %v304_v13, 0.0 }
  0xb6   :  { %957 = vmatmul.msk.f32.gmra.mxu2 %vm339_vm1, %v320_v14  ;;  %v152_v15 = vpop.f32.mrf.mxu0  ;;  %v292_v61 = vpop.f32.mrf.mxu3 }
  0xb7   :  { %v265_v16 = vpop.f32.mrf.mxu1  ;;  %v293_v63 = vadd.f32 %v292_v61, %v179_v41 }
  0xb8   :  { %v266_v17 = vadd.f32 %v265_v16, %v152_v15 }
  0xb9   :  { %v314_v0 = vadd.f32 %v1317_v48, %v293_v63 }
  0xba   :  { %v305_v18 = vadd.f32 %v1317_v48, %v266_v17 }
  0xbb   :  { %v330_v1 = vmax.f32 %v314_v0, 0.0 }
  0xbc   :  { %v321_v19 = vmax.f32 %v305_v18, 0.0 }
  0xbe   :  { %958 = vmatmul.msk.f32.gmra.mxu2 %vm339_vm1, %v321_v19  ;;  %v155_v20 = vpop.f32.mrf.mxu0 }
  0xbf   :  { %v268_v21 = vpop.f32.mrf.mxu1 }
  0xc0   :  { %v269_v22 = vadd.f32 %v268_v21, %v155_v20 }
  0xc2   :  { %v306_v23 = vadd.f32 %v1317_v48, %v269_v22 }
  0xc4   :  { %v322_v24 = vmax.f32 %v306_v23, 0.0 }
  0xc6   :  { %959 = vmatmul.msk.f32.gmra.mxu2 %vm339_vm1, %v322_v24  ;;  %v158_v26 = vpop.f32.mrf.mxu0 }
  0xc7   :  { %v271_v27 = vpop.f32.mrf.mxu1 }
  0xc8   :  { %v272_v28 = vadd.f32 %v271_v27, %v158_v26 }
  0xca   :  { %v307_v29 = vadd.f32 %v1317_v48, %v272_v28 }
  0xcc   :  { %v323_v30 = vmax.f32 %v307_v29, 0.0 }
  0xce   :  { %960 = vmatmul.msk.f32.gmra.mxu2 %vm339_vm1, %v323_v30  ;;  %v161_v31 = vpop.f32.mrf.mxu0 }
  0xcf   :  { %v274_v32 = vpop.f32.mrf.mxu1 }
  0xd0   :  { %v275_v33 = vadd.f32 %v274_v32, %v161_v31 }
  0xd2   :  { %v308_v35 = vadd.f32 %v1317_v48, %v275_v33 }
  0xd4   :  { %v324_v36 = vmax.f32 %v308_v35, 0.0 }
  0xd6   :  { %961 = vmatmul.msk.f32.gmra.mxu2 %vm339_vm1, %v324_v36  ;;  %v164_v37 = vpop.f32.mrf.mxu0 }
  0xd7   :  { %v277_v38 = vpop.f32.mrf.mxu1 }
  0xd8   :  { %v278_v39 = vadd.f32 %v277_v38, %v164_v37 }
  0xda   :  { %v309_v40 = vadd.f32 %v1317_v48, %v278_v39 }
  0xdc   :  { %v325_v42 = vmax.f32 %v309_v40, 0.0 }
  0xde   :  { %962 = vmatmul.msk.f32.gmra.mxu2 %vm339_vm1, %v325_v42  ;;  %v167_v43 = vpop.f32.mrf.mxu0 }
  0xdf   :  { %v280_v44 = vpop.f32.mrf.mxu1 }
  0xe0   :  { %v281_v45 = vadd.f32 %v280_v44, %v167_v43 }
  0xe2   :  { %v310_v46 = vadd.f32 %v1317_v48, %v281_v45 }
  0xe4   :  { %v326_v47 = vmax.f32 %v310_v46, 0.0 }
  0xe6   :  { %963 = vmatmul.msk.f32.gmra.mxu2 %vm339_vm1, %v326_v47  ;;  %v170_v50 = vpop.f32.mrf.mxu0 }
  0xe7   :  { %v283_v51 = vpop.f32.mrf.mxu1 }
  0xe8   :  { %v284_v52 = vadd.f32 %v283_v51, %v170_v50 }
  0xea   :  { %v311_v53 = vadd.f32 %v1317_v48, %v284_v52 }
  0xec   :  { %v327_v55 = vmax.f32 %v311_v53, 0.0 }
  0xee   :  { %964 = vmatmul.msk.f32.vlgmr.msra.gmra.mxu3 %vm339_vm1, %v327_v55 }
  0xf6   :  { %965 = vmatmul.msk.f32.gmra.mxu3 %vm339_vm1, %v328_v58 }
  0xfe   :  { %966 = vmatmul.msk.f32.gmra.mxu3 %vm339_vm1, %v329_v62 }
 0x106   :  { %967 = vmatmul.msk.f32.gmra.mxu3 %vm339_vm1, %v330_v1 }
 0x111   :  { %v405_v4 = vpop.f32.mrf.mxu2 }
 0x112   :  { %v455_v5 = vadd.f32 %v1354_v2, %v405_v4 }
 0x114   :  { %v968_v6 = vmul.f32 -1.442695, %v455_v5 }
 0x116   :  { %1006 = vpow2.f32 %v968_v6 }
 0x119   :  { %v408_v7 = vpop.f32.mrf.mxu2 }
 0x11a   :  { %v456_v48 = vadd.f32 %v1354_v2, %v408_v7 }
 0x11c   :  { %v1007_v8 = vpop.eup %1006  ;;  %v969_v9 = vmul.f32 -1.442695, %v456_v48 }
 0x11d   :  { %v519_v10 = vadd.f32 1.0, %v1007_v8 }
 0x11e   :  { %1008 = vpow2.f32 %v969_v9 }
 0x11f   :  { %1010 = vrcp.f32 %v519_v10  ;;  %v546_v20 = vand.u32 2147483648, %v519_v10  ;;  %v544_v23 = vand.u32 2147483647, %v519_v10  ;;  %vm540_vm3 = vweird.f32 %v519_v10 }
 0x121   :  { %v411_v11 = vpop.f32.mrf.mxu2  ;;  %v547_v29 = vor.u32 1.1754944e-38, %v546_v20  ;;  %vm545_vm5 = vcmp.eq.f32.partialorder %v544_v23, 8.507059e+37 }
 0x122   :  { %v457_v12 = vadd.f32 %v1354_v2, %v411_v11 }
 0x124   :  { %v1009_v13 = vpop.eup %1008  ;;  %v970_v14 = vmul.f32 -1.442695, %v457_v12 }
 0x125   :  { %v1011_v15 = vpop.eup %1010  ;;  %v520_v16 = vadd.f32 1.0, %v1009_v13 }
 0x126   :  { %1012 = vpow2.f32 %v970_v14  ;;  %v536_v17 = vmul.f32 %v1011_v15, %v519_v10  ;;  %vm541_vm2 = vweird.f32 %v1011_v15 }
 0x127   :  { %1014 = vrcp.f32 %v520_v16  ;;  %vm542_vm4 = vmor %vm540_vm3, %vm541_vm2  ;;  %v561_v35 = vand.u32 2147483648, %v520_v16  ;;  %v559_v38 = vand.u32 2147483647, %v520_v16  ;;  %vm555_vm7 = vweird.f32 %v520_v16 }
 0x128   :  { %v537_v18 = vsub.f32 1.0, %v536_v17 }
 0x129   :  { %v414_v19 = vpop.f32.mrf.mxu2  ;;  %v562_v44 = vor.u32 1.1754944e-38, %v561_v35  ;;  %vm560_vm9 = vcmp.eq.f32.partialorder %v559_v38, 8.507059e+37 }
 0x12a   :  { %v458_v21 = vadd.f32 %v1354_v2, %v414_v19  ;;  %v538_v22 = vmul.f32 %v1011_v15, %v537_v18 }
 0x12c   :  { %v1013_v24 = vpop.eup %1012  ;;  %v971_v25 = vmul.f32 -1.442695, %v458_v21  ;;  %v539_v26 = vadd.f32 %v1011_v15, %v538_v22 }
 0x12d   :  { %v1015_v27 = vpop.eup %1014  ;;  %v521_v28 = vadd.f32 1.0, %v1013_v24 }
 0x12e   :  { %1016 = vpow2.f32 %v971_v25  ;;  %v543_v30 = vsel %vm542_vm4, %v1011_v15, %v539_v26  ;;  %v551_v31 = vmul.f32 %v1015_v27, %v520_v16  ;;  %vm556_vm6 = vweird.f32 %v1015_v27 }
 0x12f   :  { %1018 = vrcp.f32 %v521_v28  ;;  %v548_v32 = vsel %vm545_vm5, %v547_v29, %v543_v30  ;;  %vm557_vm8 = vmor %vm555_vm7, %vm556_vm6  ;;  %v576_v51 = vand.u32 2147483648, %v521_v28  ;;  %v574_v54 = vand.u32 2147483647, %v521_v28 }
 0x130   :  { %792 = vperm.xlu0 %1002, %v548_v32   ;;  %v552_v33 = vsub.f32 1.0, %v551_v31  ;;  %vm570_vm11 = vweird.f32 %v521_v28 }
 0x131   :  { %v417_v34 = vpop.f32.mrf.mxu2  ;;  %v577_v60 = vor.u32 1.1754944e-38, %v576_v51  ;;  %vm575_vm13 = vcmp.eq.f32.partialorder %v574_v54, 8.507059e+37 }
 0x132   :  { %v459_v36 = vadd.f32 %v1354_v2, %v417_v34  ;;  %v553_v37 = vmul.f32 %v1015_v27, %v552_v33 }
 0x134   :  { %v1017_v39 = vpop.eup %1016  ;;  %v972_v40 = vmul.f32 -1.442695, %v459_v36  ;;  %v554_v41 = vadd.f32 %v1015_v27, %v553_v37 }
 0x135   :  { %v1019_v42 = vpop.eup %1018  ;;  %v522_v43 = vadd.f32 1.0, %v1017_v39 }
 0x136   :  { %1020 = vpow2.f32 %v972_v40  ;;  %v558_v45 = vsel %vm557_vm8, %v1015_v27, %v554_v41  ;;  %v566_v46 = vmul.f32 %v1019_v42, %v521_v28  ;;  %vm571_vm10 = vweird.f32 %v1019_v42 }
 0x137   :  { %1022 = vrcp.f32 %v522_v43  ;;  %v563_v47 = vsel %vm560_vm9, %v562_v44, %v558_v45  ;;  %vm572_vm12 = vmor %vm570_vm11, %vm571_vm10  ;;  %v591_v3 = vand.u32 2147483648, %v522_v43  ;;  %v589_v6 = vand.u32 2147483647, %v522_v43 }
 0x138   :  { %795 = vperm.xlu0 %1002, %v563_v47   ;;  %v567_v49 = vsub.f32 1.0, %v566_v46  ;;  %vm585_vm15 = vweird.f32 %v522_v43 }
 0x139   :  { %v420_v50 = vpop.f32.mrf.mxu2  ;;  %v592_v11 = vor.u32 1.1754944e-38, %v591_v3  ;;  %vm590_vm1 = vcmp.eq.f32.partialorder %v589_v6, 8.507059e+37 }
 0x13a   :  { %v460_v52 = vadd.f32 %v1354_v2, %v420_v50  ;;  %v568_v53 = vmul.f32 %v1019_v42, %v567_v49 }
 0x13c   :  { %v1021_v55 = vpop.eup %1020  ;;  %v973_v56 = vmul.f32 -1.442695, %v460_v52  ;;  %v569_v57 = vadd.f32 %v1019_v42, %v568_v53 }
 0x13d   :  { %v1023_v58 = vpop.eup %1022  ;;  %v523_v59 = vadd.f32 1.0, %v1021_v55 }
 0x13e   :  { %1024 = vpow2.f32 %v973_v56  ;;  %v573_v61 = vsel %vm572_vm12, %v1019_v42, %v569_v57  ;;  %v581_v62 = vmul.f32 %v1023_v58, %v522_v43  ;;  %vm586_vm14 = vweird.f32 %v1023_v58 }
 0x13f   :  { %1026 = vrcp.f32 %v523_v59  ;;  %v578_v63 = vsel %vm575_vm13, %v577_v60, %v573_v61  ;;  %vm587_vm0 = vmor %vm585_vm15, %vm586_vm14  ;;  %v606_v17 = vand.u32 2147483648, %v523_v59  ;;  %v604_v20 = vand.u32 2147483647, %v523_v59 }
 0x140   :  { %798 = vperm.xlu1 %1003, %v578_v63   ;;  %v582_v0 = vsub.f32 1.0, %v581_v62  ;;  %vm600_vm3 = vweird.f32 %v523_v59 }
 0x141   :  { %v423_v1 = vpop.f32.mrf.mxu2  ;;  %v607_v26 = vor.u32 1.1754944e-38, %v606_v17  ;;  %vm605_vm5 = vcmp.eq.f32.partialorder %v604_v20, 8.507059e+37 }
 0x142   :  { %v461_v4 = vadd.f32 %v1354_v2, %v423_v1  ;;  %v583_v5 = vmul.f32 %v1023_v58, %v582_v0 }
 0x144   :  { %v1025_v7 = vpop.eup %1024  ;;  %v974_v48 = vmul.f32 -1.442695, %v461_v4  ;;  %v584_v8 = vadd.f32 %v1023_v58, %v583_v5 }
 0x145   :  { %v1027_v9 = vpop.eup %1026  ;;  %v524_v10 = vadd.f32 1.0, %v1025_v7 }
 0x146   :  { %1028 = vpow2.f32 %v974_v48  ;;  %v588_v12 = vsel %vm587_vm0, %v1023_v58, %v584_v8  ;;  %v596_v13 = vmul.f32 %v1027_v9, %v523_v59  ;;  %vm601_vm2 = vweird.f32 %v1027_v9 }
 0x147   :  { %1030 = vrcp.f32 %v524_v10  ;;  %v593_v14 = vsel %vm590_vm1, %v592_v11, %v588_v12  ;;  %vm602_vm4 = vmor %vm600_vm3, %vm601_vm2  ;;  %v621_v32 = vand.u32 2147483648, %v524_v10  ;;  %v619_v35 = vand.u32 2147483647, %v524_v10 }
 0x148   :  { %801 = vperm.xlu1 %1003, %v593_v14   ;;  %v597_v15 = vsub.f32 1.0, %v596_v13  ;;  %vm615_vm7 = vweird.f32 %v524_v10 }
 0x149   :  { %v426_v16 = vpop.f32.mrf.mxu2  ;;  %v622_v41 = vor.u32 1.1754944e-38, %v621_v32  ;;  %vm620_vm9 = vcmp.eq.f32.partialorder %v619_v35, 8.507059e+37 }
 0x14a   :  { %v462_v18 = vadd.f32 %v1354_v2, %v426_v16  ;;  %v598_v19 = vmul.f32 %v1027_v9, %v597_v15 }
 0x14c   :  { %v1029_v21 = vpop.eup %1028  ;;  %v975_v22 = vmul.f32 -1.442695, %v462_v18  ;;  %v599_v23 = vadd.f32 %v1027_v9, %v598_v19 }
 0x14d   :  { %v1031_v24 = vpop.eup %1030  ;;  %v525_v25 = vadd.f32 1.0, %v1029_v21 }
 0x14e   :  { %1032 = vpow2.f32 %v975_v22  ;;  %v603_v27 = vsel %vm602_vm4, %v1027_v9, %v599_v23  ;;  %v611_v28 = vmul.f32 %v1031_v24, %v524_v10  ;;  %vm616_vm6 = vweird.f32 %v1031_v24 }
 0x14f   :  { %1034 = vrcp.f32 %v525_v25  ;;  %v608_v29 = vsel %vm605_vm5, %v607_v26, %v603_v27  ;;  %vm617_vm8 = vmor %vm615_vm7, %vm616_vm6  ;;  %v636_v47 = vand.u32 2147483648, %v525_v25  ;;  %v634_v51 = vand.u32 2147483647, %v525_v25 }
 0x150   :  { %804 = vperm.xlu2 %1004, %v608_v29   ;;  %v612_v30 = vsub.f32 1.0, %v611_v28  ;;  %vm630_vm11 = vweird.f32 %v525_v25 }
 0x151   :  { %v429_v31 = vpop.f32.mrf.mxu2  ;;  %v637_v57 = vor.u32 1.1754944e-38, %v636_v47  ;;  %vm635_vm13 = vcmp.eq.f32.partialorder %v634_v51, 8.507059e+37 }
 0x152   :  { %v463_v33 = vadd.f32 %v1354_v2, %v429_v31  ;;  %v613_v34 = vmul.f32 %v1031_v24, %v612_v30 }
 0x154   :  { %v1033_v36 = vpop.eup %1032  ;;  %v976_v37 = vmul.f32 -1.442695, %v463_v33  ;;  %v614_v38 = vadd.f32 %v1031_v24, %v613_v34 }
 0x155   :  { %v1035_v39 = vpop.eup %1034  ;;  %v526_v40 = vadd.f32 1.0, %v1033_v36 }
 0x156   :  { %1036 = vpow2.f32 %v976_v37  ;;  %v618_v42 = vsel %vm617_vm8, %v1031_v24, %v614_v38  ;;  %v626_v43 = vmul.f32 %v1035_v39, %v525_v25  ;;  %vm631_vm10 = vweird.f32 %v1035_v39 }
 0x157   :  { %1038 = vrcp.f32 %v526_v40  ;;  %v623_v44 = vsel %vm620_vm9, %v622_v41, %v618_v42  ;;  %vm632_vm12 = vmor %vm630_vm11, %vm631_vm10  ;;  %v651_v63 = vand.u32 2147483648, %v526_v40  ;;  %v649_v3 = vand.u32 2147483647, %v526_v40 }
 0x158   :  { %807 = vperm.xlu2 %1004, %v623_v44   ;;  %v627_v45 = vsub.f32 1.0, %v626_v43  ;;  %vm645_vm15 = vweird.f32 %v526_v40 }
 0x159   :  { %v432_v46 = vpop.f32.mrf.mxu2  ;;  %v652_v8 = vor.u32 1.1754944e-38, %v651_v63  ;;  %vm650_vm1 = vcmp.eq.f32.partialorder %v649_v3, 8.507059e+37 }
 0x15a   :  { %v464_v49 = vadd.f32 %v1354_v2, %v432_v46  ;;  %v628_v50 = vmul.f32 %v1035_v39, %v627_v45 }
 0x15c   :  { %v1037_v52 = vpop.eup %1036  ;;  %v977_v53 = vmul.f32 -1.442695, %v464_v49  ;;  %v629_v54 = vadd.f32 %v1035_v39, %v628_v50 }
 0x15d   :  { %v1039_v55 = vpop.eup %1038  ;;  %v527_v56 = vadd.f32 1.0, %v1037_v52 }
 0x15e   :  { %1040 = vpow2.f32 %v977_v53  ;;  %v633_v58 = vsel %vm632_vm12, %v1035_v39, %v629_v54  ;;  %v641_v59 = vmul.f32 %v1039_v55, %v526_v40  ;;  %vm646_vm14 = vweird.f32 %v1039_v55 }
 0x15f   :  { %1042 = vrcp.f32 %v527_v56  ;;  %v638_v60 = vsel %vm635_vm13, %v637_v57, %v633_v58  ;;  %vm647_vm0 = vmor %vm645_vm15, %vm646_vm14  ;;  %v666_v14 = vand.u32 2147483648, %v527_v56  ;;  %v664_v17 = vand.u32 2147483647, %v527_v56 }
 0x160   :  { %810 = vperm.xlu0 %1002, %v638_v60   ;;  %v642_v61 = vsub.f32 1.0, %v641_v59  ;;  %vm660_vm3 = vweird.f32 %v527_v56 }
 0x161   :  { %v435_v62 = vpop.f32.mrf.mxu2  ;;  %v667_v23 = vor.u32 1.1754944e-38, %v666_v14  ;;  %vm665_vm5 = vcmp.eq.f32.partialorder %v664_v17, 8.507059e+37 }
 0x162   :  { %v465_v0 = vadd.f32 %v1354_v2, %v435_v62  ;;  %v643_v1 = vmul.f32 %v1039_v55, %v642_v61 }
 0x164   :  { %v1041_v4 = vpop.eup %1040  ;;  %v978_v5 = vmul.f32 -1.442695, %v465_v0  ;;  %v644_v6 = vadd.f32 %v1039_v55, %v643_v1 }
 0x165   :  { %v1043_v7 = vpop.eup %1042  ;;  %v528_v48 = vadd.f32 1.0, %v1041_v4 }
 0x166   :  { %1044 = vpow2.f32 %v978_v5  ;;  %v648_v9 = vsel %vm647_vm0, %v1039_v55, %v644_v6  ;;  %v656_v10 = vmul.f32 %v1043_v7, %v527_v56  ;;  %vm661_vm2 = vweird.f32 %v1043_v7 }
 0x167   :  { %1046 = vrcp.f32 %v528_v48  ;;  %v653_v11 = vsel %vm650_vm1, %v652_v8, %v648_v9  ;;  %vm662_vm4 = vmor %vm660_vm3, %vm661_vm2  ;;  %v681_v29 = vand.u32 2147483648, %v528_v48  ;;  %v679_v32 = vand.u32 2147483647, %v528_v48 }
 0x168   :  { %813 = vperm.xlu1 %1003, %v653_v11   ;;  %v657_v12 = vsub.f32 1.0, %v656_v10  ;;  %vm675_vm7 = vweird.f32 %v528_v48 }
 0x169   :  { %v438_v13 = vpop.f32.mrf.mxu2  ;;  %v682_v38 = vor.u32 1.1754944e-38, %v681_v29  ;;  %vm680_vm9 = vcmp.eq.f32.partialorder %v679_v32, 8.507059e+37 }
 0x16a   :  { %v466_v15 = vadd.f32 %v1354_v2, %v438_v13  ;;  %v658_v16 = vmul.f32 %v1043_v7, %v657_v12 }
 0x16c   :  { %v1045_v18 = vpop.eup %1044  ;;  %v979_v19 = vmul.f32 -1.442695, %v466_v15  ;;  %v659_v20 = vadd.f32 %v1043_v7, %v658_v16 }
 0x16d   :  { %v1047_v21 = vpop.eup %1046  ;;  %v529_v22 = vadd.f32 1.0, %v1045_v18 }
 0x16e   :  { %1048 = vpow2.f32 %v979_v19  ;;  %v663_v24 = vsel %vm662_vm4, %v1043_v7, %v659_v20  ;;  %v671_v25 = vmul.f32 %v1047_v21, %v528_v48  ;;  %vm676_vm6 = vweird.f32 %v1047_v21 }
 0x16f   :  { %1050 = vrcp.f32 %v529_v22  ;;  %v668_v26 = vsel %vm665_vm5, %v667_v23, %v663_v24  ;;  %vm677_vm8 = vmor %vm675_vm7, %vm676_vm6  ;;  %v696_v44 = vand.u32 2147483648, %v529_v22  ;;  %v694_v47 = vand.u32 2147483647, %v529_v22 }
 0x170   :  { %816 = vperm.xlu2 %1004, %v668_v26   ;;  %v672_v27 = vsub.f32 1.0, %v671_v25  ;;  %vm690_vm11 = vweird.f32 %v529_v22 }
 0x171   :  { %v441_v28 = vpop.f32.mrf.mxu3  ;;  %v697_v54 = vor.u32 1.1754944e-38, %v696_v44  ;;  %vm695_vm13 = vcmp.eq.f32.partialorder %v694_v47, 8.507059e+37 }
 0x172   :  { %v467_v30 = vadd.f32 %v1354_v2, %v441_v28  ;;  %v673_v31 = vmul.f32 %v1047_v21, %v672_v27 }
 0x174   :  { %v1049_v33 = vpop.eup %1048  ;;  %v980_v34 = vmul.f32 -1.442695, %v467_v30  ;;  %v674_v35 = vadd.f32 %v1047_v21, %v673_v31 }
 0x175   :  { %v1051_v36 = vpop.eup %1050  ;;  %v530_v37 = vadd.f32 1.0, %v1049_v33 }
 0x176   :  { %1052 = vpow2.f32 %v980_v34  ;;  %v678_v39 = vsel %vm677_vm8, %v1047_v21, %v674_v35  ;;  %v686_v40 = vmul.f32 %v1051_v36, %v529_v22  ;;  %vm691_vm10 = vweird.f32 %v1051_v36 }
 0x177   :  { %1054 = vrcp.f32 %v530_v37  ;;  %v683_v41 = vsel %vm680_vm9, %v682_v38, %v678_v39  ;;  %vm692_vm12 = vmor %vm690_vm11, %vm691_vm10  ;;  %v711_v60 = vand.u32 2147483648, %v530_v37  ;;  %v709_v63 = vand.u32 2147483647, %v530_v37 }
 0x178   :  { %819 = vperm.xlu0 %1002, %v683_v41   ;;  %v687_v42 = vsub.f32 1.0, %v686_v40  ;;  %vm705_vm15 = vweird.f32 %v530_v37 }
 0x179   :  { %v444_v43 = vpop.f32.mrf.mxu3  ;;  %v712_v6 = vor.u32 1.1754944e-38, %v711_v60  ;;  %vm710_vm1 = vcmp.eq.f32.partialorder %v709_v63, 8.507059e+37 }
 0x17a   :  { %v468_v45 = vadd.f32 %v1354_v2, %v444_v43  ;;  %v688_v46 = vmul.f32 %v1051_v36, %v687_v42 }
 0x17c   :  { %v1053_v49 = vpop.eup %1052  ;;  %v981_v50 = vmul.f32 -1.442695, %v468_v45  ;;  %v689_v51 = vadd.f32 %v1051_v36, %v688_v46 }
 0x17d   :  { %v1055_v52 = vpop.eup %1054  ;;  %v531_v53 = vadd.f32 1.0, %v1053_v49 }
 0x17e   :  { %1056 = vpow2.f32 %v981_v50  ;;  %v693_v55 = vsel %vm692_vm12, %v1051_v36, %v689_v51  ;;  %v701_v56 = vmul.f32 %v1055_v52, %v530_v37  ;;  %vm706_vm14 = vweird.f32 %v1055_v52 }
 0x17f   :  { %1058 = vrcp.f32 %v531_v53  ;;  %v698_v57 = vsel %vm695_vm13, %v697_v54, %v693_v55  ;;  %vm707_vm0 = vmor %vm705_vm15, %vm706_vm14  ;;  %v726_v11 = vand.u32 2147483648, %v531_v53  ;;  %v724_v14 = vand.u32 2147483647, %v531_v53 }
 0x180   :  { %822 = vperm.xlu1 %1003, %v698_v57   ;;  %v702_v58 = vsub.f32 1.0, %v701_v56  ;;  %vm720_vm3 = vweird.f32 %v531_v53  ;;  %v839_v57 = vlaneseq }
 0x181   :  { %v447_v59 = vpop.f32.mrf.mxu3  ;;  %v727_v20 = vor.u32 1.1754944e-38, %v726_v11  ;;  %vm725_vm5 = vcmp.eq.f32.partialorder %v724_v14, 8.507059e+37 }
 0x182   :  { %v469_v61 = vadd.f32 %v1354_v2, %v447_v59  ;;  %v703_v62 = vmul.f32 %v1055_v52, %v702_v58  ;;  %v1372_v60 = vand.u32 127, %v839_v57 }
 0x184   :  { %v1057_v0 = vpop.eup %1056  ;;  %v982_v1 = vmul.f32 -1.442695, %v469_v61  ;;  %v704_v3 = vadd.f32 %v1055_v52, %v703_v62  ;;  %v842_v61 = vadd.s32 4294967288, %v1372_v60  ;;  %v846_v62 = vadd.s32 4294967280, %v1372_v60 }
 0x185   :  { %v1059_v4 = vpop.eup %1058  ;;  %v532_v5 = vadd.f32 1.0, %v1057_v0  ;;  %v850_v0 = vadd.s32 4294967272, %v1372_v60  ;;  %v858_v11 = vadd.s32 4294967256, %v1372_v60  ;;  %v866_v14 = vadd.s32 4294967240, %v1372_v60 }
 0x186   :  { %1060 = vpow2.f32 %v982_v1  ;;  %v708_v7 = vsel %vm707_vm0, %v1055_v52, %v704_v3  ;;  %v716_v48 = vmul.f32 %v1059_v4, %v531_v53  ;;  %vm721_vm2 = vweird.f32 %v1059_v4 }
 0x187   :  { %1062 = vrcp.f32 %v532_v5  ;;  %v713_v8 = vsel %vm710_vm1, %v712_v6, %v708_v7  ;;  %vm722_vm4 = vmor %vm720_vm3, %vm721_vm2  ;;  %v739_v26 = vand.u32 2147483647, %v532_v5  ;;  %vm735_vm7 = vweird.f32 %v532_v5 }
 0x188   :  { %825 = vperm.xlu2 %1004, %v713_v8   ;;  %v717_v9 = vsub.f32 1.0, %v716_v48  ;;  %vm844_vm2 = vcmask 130112   ;;  %vm848_vm3 = vcmask 195712   ;;  %v854_v48 = vadd.s32 4294967264, %v1372_v60 }
 0x189   :  { %v450_v10 = vpop.f32.mrf.mxu3  ;;  %vm740_vm9 = vcmp.eq.f32.partialorder %v739_v26, 8.507059e+37 }
 0x18a   :  { %v470_v12 = vadd.f32 %v1354_v2, %v450_v10  ;;  %v718_v13 = vmul.f32 %v1059_v4, %v717_v9  ;;  %v741_v2 = vand.u32 2147483648, %v532_v5  ;;  %v862_v10 = vadd.s32 4294967248, %v1372_v60 }
 0x18c   :  { %v1061_v15 = vpop.eup %1060  ;;  %v983_v16 = vmul.f32 -1.442695, %v470_v12  ;;  %v719_v17 = vadd.f32 %v1059_v4, %v718_v13  ;;  %v742_v31 = vor.u32 1.1754944e-38, %v741_v2 }
 0x18d   :  { %v1063_v18 = vpop.eup %1062  ;;  %v533_v19 = vadd.f32 1.0, %v1061_v15 }
 0x18e   :  { %1064 = vpow2.f32 %v983_v16  ;;  %v723_v21 = vsel %vm722_vm4, %v1059_v4, %v719_v17  ;;  %v731_v22 = vmul.f32 %v1063_v18, %v532_v5  ;;  %vm736_vm6 = vweird.f32 %v1063_v18 }
 0x18f   :  { %1066 = vrcp.f32 %v533_v19  ;;  %v728_v23 = vsel %vm725_vm5, %v727_v20, %v723_v21  ;;  %vm737_vm8 = vmor %vm735_vm7, %vm736_vm6  ;;  %v756_v36 = vand.u32 2147483648, %v533_v19  ;;  %v754_v38 = vand.u32 2147483647, %v533_v19 }
 0x190   :  { %828 = vperm.xlu0 %1002, %v728_v23   ;;  %v732_v24 = vsub.f32 1.0, %v731_v22  ;;  %vm750_vm11 = vweird.f32 %v533_v19  ;;  %vm852_vm4 = vcmask 261312   ;;  %vm856_vm5 = vcmask 326912  }
 0x191   :  { %v757_v41 = vor.u32 1.1754944e-38, %v756_v36  ;;  %vm755_vm13 = vcmp.eq.f32.partialorder %v754_v38, 8.507059e+37  ;;  %vm860_vm6 = vcmask 392512   ;;  %vm864_vm7 = vcmask 458112  }
 0x192   :  { %v733_v25 = vmul.f32 %v1063_v18, %v732_v24  ;;  %v874_v22 = vadd.s32 4294967224, %v1372_v60  ;;  %v870_v23 = vadd.s32 4294967232, %v1372_v60  ;;  %v878_v24 = vadd.s32 4294967216, %v1372_v60 }
 0x194   :  { %v1065_v27 = vpop.eup %1064  ;;  %v734_v28 = vadd.f32 %v1063_v18, %v733_v25 }
 0x195   :  { %v1067_v29 = vpop.eup %1066  ;;  %v534_v30 = vadd.f32 1.0, %v1065_v27 }
 0x196   :  { %v738_v32 = vsel %vm737_vm8, %v1063_v18, %v734_v28  ;;  %v746_v33 = vmul.f32 %v1067_v29, %v533_v19  ;;  %vm751_vm10 = vweird.f32 %v1067_v29  ;;  %vm868_vm8 = vcmask 523712  }
 0x197   :  { %1068 = vrcp.f32 %v534_v30  ;;  %v743_v34 = vsel %vm740_vm9, %v742_v31, %v738_v32  ;;  %vm752_vm12 = vmor %vm750_vm11, %vm751_vm10  ;;  %v771_v46 = vand.u32 2147483648, %v534_v30  ;;  %v769_v49 = vand.u32 2147483647, %v534_v30 }
 0x198   :  { %831 = vperm.xlu1 %1003, %v743_v34   ;;  %v747_v35 = vsub.f32 1.0, %v746_v33  ;;  %vm765_vm15 = vweird.f32 %v534_v30  ;;  %vm872_vm9 = vcmask 589312   ;;  %vm876_vm10 = vcmask 654912  }
 0x199   :  { %v772_v51 = vor.u32 1.1754944e-38, %v771_v46  ;;  %vm770_vm1 = vcmp.eq.f32.partialorder %v769_v49, 8.507059e+37  ;;  %v886_v31 = vadd.s32 4294967200, %v1372_v60  ;;  %v882_v32 = vadd.s32 4294967208, %v1372_v60 }
 0x19a   :  { %v748_v37 = vmul.f32 %v1067_v29, %v747_v35  ;;  %vm880_vm11 = vcmask 720512   ;;  %v890_v34 = vadd.s32 4294967192, %v1372_v60 }
 0x19c   :  { %v749_v39 = vadd.f32 %v1067_v29, %v748_v37 }
 0x19d   :  { %v1069_v40 = vpop.eup %1068 }
 0x19e   :  { %v753_v42 = vsel %vm752_vm12, %v1067_v29, %v749_v39  ;;  %v761_v43 = vmul.f32 %v1069_v40, %v534_v30  ;;  %vm766_vm14 = vweird.f32 %v1069_v40  ;;  %vm884_vm12 = vcmask 786112  }
 0x19f   :  { %v758_v44 = vsel %vm755_vm13, %v757_v41, %v753_v42  ;;  %vm767_vm0 = vmor %vm765_vm15, %vm766_vm14  ;;  %vm888_vm13 = vcmask 851712   ;;  %v894_v42 = vadd.s32 4294967184, %v1372_v60  ;;  %vm892_vm14 = vcmask 917312  }
 0x1a0   :  { %834 = vperm.xlu2 %1004, %v758_v44   ;;  %v762_v45 = vsub.f32 1.0, %v761_v43  ;;  %vm896_vm15 = vcmask 982912  }
 0x1a2   :  { %v763_v47 = vmul.f32 %v1069_v40, %v762_v45  ;;  %v793_v54 = vpop.permute.xlu0 %792  ;;  %v898_v45 = vadd.s32 4294967176, %v1372_v60 }
 0x1a3   :  { %v841_v6 = vperm.slane %v793_v54, %v1372_v60 }
 0x1a4   :  { %v764_v50 = vadd.f32 %v1069_v40, %v763_v47 }
 0x1a6   :  { %v768_v52 = vsel %vm767_vm0, %v1069_v40, %v764_v50  ;;  %vm900_vm0 = vcmask 1048512  }
 0x1a7   :  { %v773_v53 = vsel %vm770_vm1, %v772_v51, %v768_v52 }
 0x1a8   :  { %837 = vperm.xlu0 %1002, %v773_v53  }
 0x1aa   :  { %v805_v56 = vpop.permute.xlu2 %804  ;;  %v796_v58 = vpop.permute.xlu0 %795 }
 0x1ab   :  { %v843_v1 = vperm.slane %v796_v58, %v842_v61  ;;  %v855_v15 = vperm.slane %v805_v56, %v854_v48 }
 0x1ad   :  { %v845_v8 = vsel %vm844_vm2, %v843_v1, %v841_v6 }
 0x1b2   :  { %v799_v55 = vpop.permute.xlu1 %798  ;;  %v808_v63 = vpop.permute.xlu2 %807 }
 0x1b3   :  { %v847_v4 = vperm.slane %v799_v55, %v846_v62  ;;  %v859_v20 = vperm.slane %v808_v63, %v858_v11 }
 0x1b5   :  { %v849_v9 = vsel %vm848_vm3, %v847_v4, %v845_v8 }
 0x1ba   :  { %v802_v59 = vpop.permute.xlu1 %801 }
 0x1bb   :  { %v851_v7 = vperm.slane %v802_v59, %v850_v0 }
 0x1bd   :  { %v853_v12 = vsel %vm852_vm4, %v851_v7, %v849_v9 }
 0x1be   :  { %v857_v17 = vsel %vm856_vm5, %v855_v15, %v853_v12 }
 0x1bf   :  { %v861_v2 = vsel %vm860_vm6, %v859_v20, %v857_v17 }
 0x1ca   :  { %v817_v13 = vpop.permute.xlu2 %816 }
 0x1cb   :  { %v871_v29 = vperm.slane %v817_v13, %v870_v23 }
 0x1d2   :  { %v811_v3 = vpop.permute.xlu0 %810 }
 0x1d3   :  { %v863_v18 = vperm.slane %v811_v3, %v862_v10 }
 0x1d5   :  { %v865_v25 = vsel %vm864_vm7, %v863_v18, %v861_v2 }
 0x1da   :  { %v814_v5 = vpop.permute.xlu1 %813 }
 0x1db   :  { %v867_v21 = vperm.slane %v814_v5, %v866_v14 }
 0x1dd   :  { %v869_v26 = vsel %vm868_vm8, %v867_v21, %v865_v25 }
 0x1de   :  { %v873_v35 = vsel %vm872_vm9, %v871_v29, %v869_v26 }
 0x1e2   :  { %v826_v27 = vpop.permute.xlu2 %825 }
 0x1e3   :  { %v883_v40 = vperm.slane %v826_v27, %v882_v32 }
 0x1ea   :  { %v820_v16 = vpop.permute.xlu0 %819 }
 0x1eb   :  { %v875_v28 = vperm.slane %v820_v16, %v874_v22 }
 0x1ed   :  { %v877_v37 = vsel %vm876_vm10, %v875_v28, %v873_v35 }
 0x1f2   :  { %v823_v19 = vpop.permute.xlu1 %822 }
 0x1f3   :  { %v879_v30 = vperm.slane %v823_v19, %v878_v24 }
 0x1f5   :  { %v881_v38 = vsel %vm880_vm11, %v879_v30, %v877_v37 }
 0x1f6   :  { %v885_v44 = vsel %vm884_vm12, %v883_v40, %v881_v38 }
 0x1fa   :  { %v835_v43 = vpop.permute.xlu2 %834 }
 0x1fb   :  { %v895_v49 = vperm.slane %v835_v43, %v894_v42 }
 0x202   :  { %v829_v33 = vpop.permute.xlu0 %828 }
 0x203   :  { %v887_v39 = vperm.slane %v829_v33, %v886_v31 }
 0x205   :  { %v889_v46 = vsel %vm888_vm13, %v887_v39, %v885_v44 }
 0x20a   :  { %v832_v36 = vpop.permute.xlu1 %831 }
 0x20b   :  { %v891_v41 = vperm.slane %v832_v36, %v890_v34 }
 0x20d   :  { %v893_v47 = vsel %vm892_vm14, %v891_v41, %v889_v46 }
 0x20e   :  { %v897_v52 = vsel %vm896_vm15, %v895_v49, %v893_v47 }
 0x21a   :  { %v838_v50 = vpop.permute.xlu0 %837 }
 0x21b   :  { %v899_v51 = vperm.slane %v838_v50, %v898_v45 }
 0x21d   :  { %v901_v53 = vsel %vm900_vm0, %v899_v51, %v897_v52 }
 0x21e   :  { %903 = vst [vmem:[#allocation3] sm:$0x1] %v901_v53 }
 0x21f   :  { %914 = dma.vmem_to_hbm [thread:$0]  %s910_s3, 16, %s912_s23, [#allocation4]  }
 0x220   :  { %1094 = dma.done.wait [#allocation4], 16  }
 0x221   :  { %1095 = vsyncadd [#allocation4], 4294967280 }
 0x222   :  { %919 = vsyncpa [#allocation4], 1 }

</bundles_post_ra>
